<compile_context>
chip_gen: v7x
topology: tpu7x:2x2x1
jax: 0.10.0
libtpu: 0.0.40
codegen_flags: <defaults>
</compile_context>

<pallas_src>
import functools

import jax
import jax.numpy as jnp
import numpy as np
from jax.experimental import pallas as pl
from jax.experimental.pallas import tpu as pltpu

_LANE = 128
_SUBLANE = 32                      # safe 2nd-minor tile multiple (f32/bf16/int8)
_TARGET_STEP_BYTES = 4 << 20       # per-grid-step working-set target
_MAX_STEP_BYTES = 12 << 20         # beyond this even at minimum tiling -> fallback
_MIB = 1 << 20


def _concat_copy_kernel(*refs, concat_dim):
    """refs = (*in_refs, out_ref). Pure copy: each input -> its static slab."""
    out_ref = refs[-1]
    in_refs = refs[:-1]
    off = 0
    for r in in_refs:
        n = r.shape[concat_dim]
        idx = [slice(None)] * len(out_ref.shape)
        idx[concat_dim] = slice(off, off + n)   # static slice: no runtime index math
        out_ref[tuple(idx)] = r[...].astype(out_ref.dtype)
        off += n


def pallas_concat(arrays, axis, *, min_pallas_bytes=64 * 1024):
    """torch.cat(arrays, axis) with the copy done by a tiled Pallas TPU kernel."""
    arrays = [jnp.asarray(a) for a in arrays]
    if not arrays:
        raise ValueError("pallas_concat needs at least one input")
    ndim = arrays[0].ndim
    if ndim == 0:
        raise ValueError("pallas_concat expects tensors with at least 1 dim")
    ax = axis % ndim
    out_dtype = jnp.result_type(*arrays)        # torch.cat-style dtype promotion

    base = arrays[0].shape
    for a in arrays:
        if a.ndim != ndim or any(a.shape[d] != base[d]
                                 for d in range(ndim) if d != ax):
            raise ValueError(f"concat shape mismatch: {a.shape} vs {base} (axis {ax})")

    total_ax = sum(int(a.shape[ax]) for a in arrays)
    out_shape_nd = tuple(base[:ax]) + (total_ax,) + tuple(base[ax + 1:])

    outer = int(np.prod(base[:ax], dtype=np.int64))
    inner = int(np.prod(base[ax + 1:], dtype=np.int64))
    itemsize_out = jnp.dtype(out_dtype).itemsize

    # Zero-size inputs along the concat axis contribute no data (but they did
    # participate in dtype promotion above).
    parts = [a for a in arrays if int(a.shape[ax]) > 0]
    total_bytes = (sum(int(a.size) * a.dtype.itemsize for a in parts)
                   + int(np.prod(out_shape_nd, dtype=np.int64)) * itemsize_out)

    # Degenerate / tiny problems: fixed pallas_call launch cost dominates and
    # XLA fuses a plain concatenate into neighbours for free.
    if (len(parts) <= 1 or outer == 0 or inner == 0 or total_ax == 0
            or total_bytes < min_pallas_bytes):
        return jnp.concatenate(arrays, axis=ax).astype(out_dtype)

    ax_sizes = [int(a.shape[ax]) for a in parts]
    in_itemsizes = [a.dtype.itemsize for a in parts]

    if inner == 1:
        # ---- Path A: concat axis is the innermost flattened dim --------------
        # Flatten to 2-D [outer, ax_i]; concat is column slabs; tile rows.
        # (Column offsets not 128-lane aligned lower to masked stores; this is
        #  unavoidable without changing the output layout.)
        row_bytes = (sum(w * b for w, b in zip(ax_sizes, in_itemsizes))
                     + total_ax * itemsize_out)
        tm = min(outer, max(1, _TARGET_STEP_BYTES // row_bytes))
        if tm < outer:
            tm = max(_SUBLANE, (tm // _SUBLANE) * _SUBLANE)   # keep tiling legal
            tm = min(tm, outer)
        per_step = tm * row_bytes

        flat_parts = [a.reshape(outer, w) for a, w in zip(parts, ax_sizes)]
        flat_out_shape = (outer, total_ax)
        grid = (pl.cdiv(outer, tm),)
        in_specs = [pl.BlockSpec((tm, w), lambda i: (i, 0)) for w in ax_sizes]
        out_specs = pl.BlockSpec((tm, total_ax), lambda i: (i, 0))
        dim_semantics = ("parallel",)
    else:
        # ---- Path B: dims exist after the concat axis -------------------------
        # Flatten to 3-D [outer, ax_i, inner]; concat lands on the second-minor
        # dim -> lane-dense stores, good sublane utilisation even for outer=2.
        col_bytes = (sum(w * b for w, b in zip(ax_sizes, in_itemsizes))
                     + total_ax * itemsize_out)
        slice_bytes = col_bytes * inner           # one full outer-slice
        if slice_bytes <= _TARGET_STEP_BYTES:
            tn = inner
            tb = min(outer, max(1, _TARGET_STEP_BYTES // slice_bytes))
        else:
            tb = 1
            if inner <= _LANE:
                tn = inner
            else:
                tn = min(inner,
                         max(_LANE,
                             ((_TARGET_STEP_BYTES // col_bytes) // _LANE) * _LANE))
        per_step = tb * tn * col_bytes

        flat_parts = [a.reshape(outer, w, inner) for a, w in zip(parts, ax_sizes)]
        flat_out_shape = (outer, total_ax, inner)
        grid = (pl.cdiv(outer, tb), pl.cdiv(inner, tn))
        in_specs = [pl.BlockSpec((tb, w, tn), lambda o, n: (o, 0, n))
                    for w in ax_sizes]
        out_specs = pl.BlockSpec((tb, total_ax, tn), lambda o, n: (o, 0, n))
        dim_semantics = ("parallel", "parallel")

    if per_step > _MAX_STEP_BYTES:
        # TODO(synk): the concat-axis extent cannot be tiled across inputs with
        # static index maps; such untileable giants fall back to XLA's concat.
        return jnp.concatenate(arrays, axis=ax).astype(out_dtype)

    # VMEM budget: double-buffered blocks + padding headroom. Never below the
    # default scoped limits, always far under v7x's 64 MiB physical VMEM.
    needed_vmem = int(3 * per_step + 2 * _MIB)
    vmem_limit = int(max(needed_vmem, 32 * _MIB))

    flat_out = pl.pallas_call(
        functools.partial(_concat_copy_kernel, concat_dim=1),
        out_shape=jax.ShapeDtypeStruct(flat_out_shape, out_dtype),
        grid=grid,
        in_specs=in_specs,
        out_specs=out_specs,
        compiler_params=pltpu.CompilerParams(
            dimension_semantics=dim_semantics,
            vmem_limit_bytes=vmem_limit,
        ),
        cost_estimate=pl.CostEstimate(
            flops=0, transcendentals=0, bytes_accessed=int(total_bytes)),
    )(*flat_parts)

    return flat_out.reshape(out_shape_nd)


class TorchConcatPallas:
    """Mirror of onnxutils TorchConcat: forward(*args) -> cat(args, axis)."""

    def __init__(self, axis, *, min_pallas_bytes=64 * 1024):
        self.axis = axis
        self.min_pallas_bytes = min_pallas_bytes

    def __call__(self, *args):
        return pallas_concat(list(args), self.axis,
                             min_pallas_bytes=self.min_pallas_bytes)


if __name__ == "__main__":
    key = jax.random.PRNGKey(0)
    k1, k2, k3, k4, k5 = jax.random.split(key, 5)

    # Test 1: NCHW channel concat (axis=1) -> 3-D path, lane-dense stores.
    x1 = jax.random.normal(k1, (2, 4, 16, 16), dtype=jnp.float32)
    x2 = jax.random.normal(k2, (2, 3, 16, 16), dtype=jnp.float32)
    x3 = jax.random.normal(k3, (2, 5, 16, 16), dtype=jnp.float32)
    module = TorchConcatPallas(axis=1, min_pallas_bytes=0)   # force the kernel path
    out = jax.block_until_ready(module(x1, x2, x3))
    ref = jnp.concatenate([x1, x2, x3], axis=1)
    assert out.shape == ref.shape and out.dtype == ref.dtype, (out.shape, ref.shape)
    np.testing.assert_array_equal(np.asarray(out), np.asarray(ref))

    # Test 2: last-axis concat with mixed dtypes (torch.cat-style promotion).
    y1 = jax.random.normal(k4, (2, 8, 32), dtype=jnp.float32)
    y2 = jax.random.normal(k5, (2, 8, 16), dtype=jnp.bfloat16)
    module2 = TorchConcatPallas(axis=-1, min_pallas_bytes=0)
    out2 = jax.block_until_ready(module2(y1, y2))
    ref2 = jnp.concatenate([y1, y2], axis=-1)
    assert out2.shape == ref2.shape and out2.dtype == ref2.dtype, (out2.shape, ref2.shape)
    np.testing.assert_array_equal(np.asarray(out2), np.asarray(ref2))

    print("KERNEL_OK")
</pallas_src>

<mosaic_0001>
module attributes {stable_mosaic.version = 11 : i64} {
  func.func @_concat_copy_kernel(%arg0: i32, %arg1: i32, %arg2: memref<2x4x256xf32, #tpu.memory_space<vmem>>, %arg3: memref<2x3x256xf32, #tpu.memory_space<vmem>>, %arg4: memref<2x5x256xf32, #tpu.memory_space<vmem>>, %arg5: memref<2x12x256xf32, #tpu.memory_space<vmem>>) attributes {dimension_semantics = [#tpu.dimension_semantics<parallel>, #tpu.dimension_semantics<parallel>], iteration_bounds = array<i64: 1, 1>, scalar_prefetch = 0 : i64, scratch_operands = 0 : i64, tpu.core_type = #tpu.core_type<tc>, window_params = [{transform_indices = @transform_0, window_bounds = array<i64: 2, 4, 256>}, {transform_indices = @transform_1, window_bounds = array<i64: 2, 3, 256>}, {transform_indices = @transform_2, window_bounds = array<i64: 2, 5, 256>}, {transform_indices = @transform_3, window_bounds = array<i64: 2, 12, 256>}]} {
    %c0 = arith.constant 0 : index
    %c0_0 = arith.constant 0 : index
    %c0_1 = arith.constant 0 : index
    %0 = vector.load %arg2[%c0, %c0_0, %c0_1] : memref<2x4x256xf32, #tpu.memory_space<vmem>>, vector<2x4x256xf32>
    %c0_2 = arith.constant 0 : index
    %c0_3 = arith.constant 0 : index
    %c0_4 = arith.constant 0 : index
    %1 = vector.load %arg5[%c0_2, %c0_3, %c0_4] : memref<2x12x256xf32, #tpu.memory_space<vmem>>, vector<2x4x256xf32>
    tpu.vector_store %arg5[%c0_2, %c0_3, %c0_4], %0 {strides = array<i32>} : memref<2x12x256xf32, #tpu.memory_space<vmem>>, vector<2x4x256xf32>,
    %c0_5 = arith.constant 0 : index
    %c0_6 = arith.constant 0 : index
    %c0_7 = arith.constant 0 : index
    %2 = vector.load %arg3[%c0_5, %c0_6, %c0_7] : memref<2x3x256xf32, #tpu.memory_space<vmem>>, vector<2x3x256xf32>
    %c0_8 = arith.constant 0 : index
    %c4 = arith.constant 4 : index
    %c0_9 = arith.constant 0 : index
    %3 = vector.load %arg5[%c0_8, %c4, %c0_9] : memref<2x12x256xf32, #tpu.memory_space<vmem>>, vector<2x3x256xf32>
    tpu.vector_store %arg5[%c0_8, %c4, %c0_9], %2 {strides = array<i32>} : memref<2x12x256xf32, #tpu.memory_space<vmem>>, vector<2x3x256xf32>,
    %c0_10 = arith.constant 0 : index
    %c0_11 = arith.constant 0 : index
    %c0_12 = arith.constant 0 : index
    %4 = vector.load %arg4[%c0_10, %c0_11, %c0_12] : memref<2x5x256xf32, #tpu.memory_space<vmem>>, vector<2x5x256xf32>
    %c0_13 = arith.constant 0 : index
    %c7 = arith.constant 7 : index
    %c0_14 = arith.constant 0 : index
    %5 = vector.load %arg5[%c0_13, %c7, %c0_14] : memref<2x12x256xf32, #tpu.memory_space<vmem>>, vector<2x5x256xf32>
    tpu.vector_store %arg5[%c0_13, %c7, %c0_14], %4 {strides = array<i32>} : memref<2x12x256xf32, #tpu.memory_space<vmem>>, vector<2x5x256xf32>,
    return
  }
  func.func @transform_0(%arg0: i32, %arg1: i32) -> (i32, i32, i32) {
    %c0_i32 = arith.constant 0 : i32
    %c0_i32_0 = arith.constant 0 : i32
    return %arg0, %c0_i32, %arg1 : i32, i32, i32
  }
  func.func @transform_1(%arg0: i32, %arg1: i32) -> (i32, i32, i32) {
    %c0_i32 = arith.constant 0 : i32
    %c0_i32_0 = arith.constant 0 : i32
    return %arg0, %c0_i32, %arg1 : i32, i32, i32
  }
  func.func @transform_2(%arg0: i32, %arg1: i32) -> (i32, i32, i32) {
    %c0_i32 = arith.constant 0 : i32
    %c0_i32_0 = arith.constant 0 : i32
    return %arg0, %c0_i32, %arg1 : i32, i32, i32
  }
  func.func @transform_3(%arg0: i32, %arg1: i32) -> (i32, i32, i32) {
    %c0_i32 = arith.constant 0 : i32
    %c0_i32_0 = arith.constant 0 : i32
    return %arg0, %c0_i32, %arg1 : i32, i32, i32
  }
}

</mosaic_0001>

<bundles_post_ra>
// kernel: tpu_custom_call.1
= control target key start
LH: loop header
LB: loop body
LE: loop exit
PB: predicated region body
PF: predicated region fallthrough
CT: control target
= control target key end

     0   :  { %s150_s0 = inlined_call_operand.vmem [shape: f32[2,4,256], index: 0, kind: input, shape index: {}]   ;;  %s151_s3 = inlined_call_operand.vmem [shape: f32[2,12,256], index: 3, kind: output, shape index: {}]   ;;  %s152_s1 = inlined_call_operand.vmem [shape: f32[2,3,256], index: 1, kind: input, shape index: {}]   ;;  %s153_s2 = inlined_call_operand.vmem [shape: f32[2,5,256], index: 2, kind: input, shape index: {}]  }
   0x1   :  { %v14_v0 = vld [vmem:[%s150_s0] sm:$0xff]  ;;  %v15_v1 = vld [vmem:[%s150_s0 + $0x8] sm:$0xff]  ;;  %v40_v12 = vld [vmem:[%s153_s2 + $0x10] sm:$0x1f] }
   0x2   :  { %v26_v2 = vld [vmem:[%s152_s1] sm:$0x77]  ;;  %22 = vst [vmem:[%s151_s3] sm:$0xf] %v14_v0  ;;  %v18_v3 = vcombine.high %v14_v0, %v14_v0  ;;  %24 = vst [vmem:[%s151_s3 + $0x20] sm:$0xf] %v15_v1  ;;  %v19_v4 = vcombine.high %v15_v1, %v15_v1  ;;  %v48_v14 = vrot.slane %v40_v12, 1 }
   0x3   :  { %v30_v5 = vcombine.low %v26_v2, %v26_v2  ;;  %35 = vst [vmem:[%s151_s3 + $0x8] sm:$0x70] %v26_v2  ;;  %v27_v6 = vld [vmem:[%s152_s1 + $0x8] sm:$0x77]  ;;  %v38_v7 = vld [vmem:[%s153_s2] sm:$0x1f] }
   0x4   :  { %v39_v8 = vld [vmem:[%s153_s2 + $0x8] sm:$0x1f]  ;;  %v31_v9 = vcombine.low %v27_v6, %v27_v6  ;;  %37 = vst [vmem:[%s151_s3 + $0x28] sm:$0x70] %v27_v6  ;;  %v46_v10 = vrot.slane %v38_v7, 1 }
   0x5   :  { %v47_v11 = vrot.slane %v39_v8, 1  ;;  %v41_v13 = vld [vmem:[%s153_s2 + $0x18] sm:$0x1f]  ;;  %23 = vst [vmem:[%s151_s3 + $0x8] sm:$0xf] %v18_v3  ;;  %34 = vst [vmem:[%s151_s3] sm:$0x70] %v30_v5 }
   0x6   :  { %25 = vst [vmem:[%s151_s3 + $0x28] sm:$0xf] %v19_v4  ;;  %v49_v15 = vrot.slane %v41_v13, 1  ;;  %36 = vst [vmem:[%s151_s3 + $0x20] sm:$0x70] %v31_v9 }
   0x7   :  { %54 = vst [vmem:[%s151_s3 + $0x10] ss:$-12 sps:$4 sm:$0x8f] %v46_v10   ;;  %55 = vst [vmem:[%s151_s3 + $0x18] ss:$-12 sps:$4 sm:$0x8f] %v47_v11  }
   0x8   :  { %58 = vst [vmem:[%s151_s3 + $0x30] ss:$-12 sps:$4 sm:$0x8f] %v48_v14   ;;  %59 = vst [vmem:[%s151_s3 + $0x38] ss:$-12 sps:$4 sm:$0x8f] %v49_v15  }

</bundles_post_ra>
